<compile_context>
chip_gen: v7x
topology: tpu7x:2x2x1
jax: 0.10.0
libtpu: 0.0.40
codegen_flags: <defaults>
</compile_context>

<pallas_src>
import functools

import jax
import jax.numpy as jnp
from jax.experimental import pallas as pl
from jax.experimental.pallas import tpu as pltpu

NUM_PARALLEL = 2  # v7x has 2 TensorCores; a size-2 "parallel" axis is harmless on v5e/v6e.


def _spatial_border_loss_kernel(x_ref, out_ref, acc_ref, *, n_total):
    t = pl.program_id(1)

    @pl.when(t == 0)
    def _init():
        acc_ref[...] = jnp.zeros_like(acc_ref)

    data = x_ref[...]              # (27, T)
    px = data[0:9, :]              # (9, T)  x of the 9 sub-points
    py = data[9:18, :]             # (9, T)  y of the 9 sub-points
    gx = data[18:22, :]            # (4, T)  quad corner x1..x4
    gy = data[22:26, :]            # (4, T)  quad corner y1..y4
    w = data[26:27, :]             # (1, T)  per-sample weight

    # Valid-lane mask computed in-kernel from the static element count
    # (replaces the old explicit 'valid' input row).
    tile = px.shape[1]
    base = (pl.program_id(0) * pl.num_programs(1) + t) * tile
    lane = jax.lax.broadcasted_iota(jnp.int32, (1, tile), 1)
    valid = ((base + lane) < n_total).astype(jnp.float32)            # (1, T)

    # PNPOLY ray casting (same logic as pointsJf), vectorized over all 9 sub-points:
    #   - division-free: ((u_i*dy - dx*t_i) * dy) < 0 is exactly
    #     px < xi + dx*(py - yi)/dy when dy != 0; dy == 0 is gated by crosses_y.
    #   - per-vertex terms hoisted out of the 4-edge loop.
    tv = [py - gy[k:k + 1, :] for k in range(4)]      # py - y_k      (9, T)
    uv = [px - gx[k:k + 1, :] for k in range(4)]      # px - x_k      (9, T)
    sv = [tk < 0.0 for tk in tv]                      # (y_k > py)    (9, T) bool

    inside = jnp.zeros(px.shape, dtype=jnp.bool_)     # (9, T)
    for i in range(4):                                # unrolled at trace time
        j = (i + 3) % 4
        dy = gy[j:j + 1, :] - gy[i:i + 1, :]          # (1, T)
        dx = gx[j:j + 1, :] - gx[i:i + 1, :]          # (1, T)
        crosses_y = sv[i] != sv[j]                    # (9, T)
        cmp = ((uv[i] * dy - dx * tv[i]) * dy) < 0.0  # (9, T)
        inside = jnp.logical_xor(inside, jnp.logical_and(crosses_y, cmp))

    # gt quad "center" as in the reference: midpoint of corner 1 and corner 3.
    cx = (gx[0:1, :] + gx[2:3, :]) * 0.5              # (1, T)
    cy = (gy[0:1, :] + gy[2:3, :]) * 0.5              # (1, T)

    outside = jnp.logical_not(inside).astype(jnp.float32) * valid    # (9, T)
    ddx = px - cx
    ddy = py - cy
    dist = jnp.sqrt(ddx * ddx + ddy * ddy)            # (9, T); 0.2 folded in epilogue

    # Per-lane partials; single fused (3, T) accumulator update.
    sum_dist = jnp.sum(outside * dist, axis=0, keepdims=True)        # (1, T)
    sum_out = jnp.sum(outside, axis=0, keepdims=True)                # (1, T)
    wrow = (w > 0.0).astype(jnp.float32) * valid                     # (1, T)
    acc_ref[...] += jnp.concatenate([sum_dist, sum_out, wrow], axis=0)

    @pl.when(t == pl.num_programs(1) - 1)
    def _finalize():
        acc = acc_ref[...]
        total = jnp.sum(acc[0:1, :])
        count = jnp.sum(acc[1:2, :])
        wcnt = jnp.sum(acc[2:3, :])
        # Lane-dense (8, 128) output slab: row 0 = total, row 1 = count, row 2 = wcnt.
        row = jax.lax.broadcasted_iota(jnp.int32, (8, 128), 0)
        slab = jnp.where(row == 0, total,
               jnp.where(row == 1, count,
               jnp.where(row == 2, wcnt, 0.0))).astype(jnp.float32)
        out_ref[...] = slab[None]


@functools.partial(jax.jit, static_argnames=("loss_weight", "tile_n"))
def spatial_border_loss_pallas(pts, gt_bboxes, weight, loss_weight=1.0, tile_n=32768):
    """pts: (N, 18), gt_bboxes: (N, 8), weight: (N,). Returns shape (1,) f32."""
    assert tile_n % 128 == 0
    pts = pts.astype(jnp.float32)
    gt = gt_bboxes.astype(jnp.float32)
    w = weight.astype(jnp.float32).reshape(-1)
    n = pts.shape[0]
    assert gt.shape[0] == n and w.shape[0] == n and n > 0

    # --- fused (27, n) lane-dense layout: one concat + one transpose + one pad ---
    pts_r = pts.reshape(n, 9, 2)
    gt_r = gt.reshape(n, 4, 2)
    fused = jnp.concatenate(
        [pts_r[:, :, 0], pts_r[:, :, 1], gt_r[:, :, 0], gt_r[:, :, 1], w[:, None]],
        axis=1).T                                                    # (27, n)

    n128 = ((n + 127) // 128) * 128
    tile = min(tile_n, n128)
    num_tiles = pl.cdiv(n128, tile)
    # Unconditional 2-way split of the tile axis across TensorCores (v7x megacore);
    # padded tiles / lanes contribute nothing thanks to the in-kernel valid mask.
    num_tiles = ((num_tiles + NUM_PARALLEL - 1) // NUM_PARALLEL) * NUM_PARALLEL
    tiles_per_chunk = num_tiles // NUM_PARALLEL
    n_pad = num_tiles * tile
    fused_p = jnp.pad(fused, ((0, 0), (0, n_pad - n)))               # (27, n_pad)

    lane_map = lambda p, t: (0, p * tiles_per_chunk + t)

    kernel = functools.partial(_spatial_border_loss_kernel, n_total=n)

    partials = pl.pallas_call(
        kernel,
        out_shape=jax.ShapeDtypeStruct((NUM_PARALLEL, 8, 128), jnp.float32),
        grid_spec=pltpu.PrefetchScalarGridSpec(
            num_scalar_prefetch=0,
            grid=(NUM_PARALLEL, tiles_per_chunk),
            in_specs=[pl.BlockSpec((27, tile), lane_map)],
            out_specs=pl.BlockSpec((1, 8, 128), lambda p, t: (p, 0, 0)),
            scratch_shapes=[pltpu.VMEM((3, tile), jnp.float32)],
        ),
        compiler_params=pltpu.CompilerParams(
            dimension_semantics=("parallel", "arbitrary"),
        ),
    )(fused_p)

    # --- tiny scalar epilogue (combine per-core partials, fold 0.2 / loss_weight) ---
    total = jnp.sum(partials[:, 0, 0])
    count = jnp.sum(partials[:, 1, 0])
    wcnt = jnp.sum(partials[:, 2, 0])
    loss = jnp.where(count > 0, 0.2 * total / jnp.maximum(count, 1.0), 0.0)
    avg_factor = wcnt + 1e-6
    return (loss_weight * loss / avg_factor)[None]


def _reference_jax(pts, gt, weight, loss_weight=1.0):
    """Pure-JAX reference mirroring the PyTorch code (for validation only)."""
    n = pts.shape[0]
    cx = (gt[:, 0] + gt[:, 4]) / 2.0
    cy = (gt[:, 1] + gt[:, 5]) / 2.0
    pts_r = pts.reshape(n, 9, 2)
    total = 0.0
    count = 0.0
    for k in range(9):
        px, py = pts_r[:, k, 0], pts_r[:, k, 1]
        inside = jnp.zeros((n,), bool)
        for i in range(4):
            j = (i + 3) % 4
            xi, yi = gt[:, 2 * i], gt[:, 2 * i + 1]
            xj, yj = gt[:, 2 * j], gt[:, 2 * j + 1]
            cond = ((yi > py) != (yj > py)) & (
                px < (xj - xi) * (py - yi) / (yj - yi) + xi)
            inside = inside ^ cond
        out_mask = (~inside).astype(jnp.float32)
        dist = 0.2 * jnp.sqrt((px - cx) ** 2 + (py - cy) ** 2)
        total = total + jnp.sum(out_mask * dist)
        count = count + jnp.sum(out_mask)
    loss = jnp.where(count > 0, total / jnp.maximum(count, 1.0), 0.0)
    avg_factor = jnp.sum((weight > 0).astype(jnp.float32)) + 1e-6
    return (loss_weight * loss / avg_factor)[None]


def _make_inputs(key, n):
    k1, k2, k3, k4 = jax.random.split(key, 4)
    # Convex quad gt boxes: axis-aligned rectangles given as 4 corners.
    centers = jax.random.uniform(k1, (n, 2), jnp.float32, 4.0, 12.0)
    halves = jax.random.uniform(k2, (n, 2), jnp.float32, 1.0, 3.0)
    cxs, cys = centers[:, 0], centers[:, 1]
    hw, hh = halves[:, 0], halves[:, 1]
    gt_bboxes = jnp.stack(
        [cxs - hw, cys - hh, cxs + hw, cys - hh,
         cxs + hw, cys + hh, cxs - hw, cys + hh], axis=1)  # (n, 8)
    # 9 sub-points per sample, scattered around the box center (some outside).
    offsets = jax.random.uniform(k3, (n, 9, 2), jnp.float32, -4.0, 4.0)
    pts = (centers[:, None, :] + offsets).reshape(n, 18)   # (n, 18)
    weight = (jax.random.uniform(k4, (n,), jnp.float32) > 0.3).astype(jnp.float32)
    return pts, gt_bboxes, weight


if __name__ == "__main__":
    key = jax.random.PRNGKey(0)
    k_small, k_big = jax.random.split(key, 2)

    # Small case: single 128-lane tile per parallel chunk (chunk 1 is all padding).
    pts, gt_bboxes, weight = _make_inputs(k_small, 8)
    out = spatial_border_loss_pallas(pts, gt_bboxes, weight, loss_weight=1.0)
    out = jax.block_until_ready(out)
    ref = _reference_jax(pts, gt_bboxes, weight, loss_weight=1.0)
    assert out.shape == (1,)
    assert jnp.allclose(out, ref, rtol=1e-4, atol=1e-6), (out, ref)

    # Larger case: exercises lane padding, multi-tile accumulation and the
    # 2-way parallel split (8 tiles of 128 lanes -> 2 chunks of 4 tiles).
    pts2, gt2, w2 = _make_inputs(k_big, 1000)
    out2 = spatial_border_loss_pallas(pts2, gt2, w2, loss_weight=1.0, tile_n=128)
    out2 = jax.block_until_ready(out2)
    ref2 = _reference_jax(pts2, gt2, w2, loss_weight=1.0)
    assert out2.shape == (1,)
    assert jnp.allclose(out2, ref2, rtol=1e-4, atol=1e-6), (out2, ref2)

    print("KERNEL_OK")
</pallas_src>

<mosaic_0001>
module attributes {stable_mosaic.version = 11 : i64} {
  func.func @_spatial_border_loss_kernel(%arg0: i32, %arg1: i32, %arg2: memref<27x128xf32, #tpu.memory_space<vmem>>, %arg3: memref<1x8x128xf32, #tpu.memory_space<vmem>>, %arg4: memref<3x128xf32, #tpu.memory_space<vmem>>) attributes {dimension_semantics = [#tpu.dimension_semantics<parallel>, #tpu.dimension_semantics<arbitrary>], iteration_bounds = array<i64: 2, 1>, scalar_prefetch = 0 : i64, scratch_operands = 1 : i64, tpu.core_type = #tpu.core_type<tc>, window_params = [{transform_indices = @transform_0, window_bounds = array<i64: 27, 128>}, {transform_indices = @transform_1, window_bounds = array<i64: 1, 8, 128>}]} {
    %c0_i32 = arith.constant 0 : i32
    %0 = arith.cmpi eq, %arg1, %c0_i32 : i32
    %1 = arith.extui %0 : i1 to i32
    %c0_i32_0 = arith.constant 0 : i32
    %2 = arith.cmpi ne, %1, %c0_i32_0 : i32
    scf.if %2 {
      %cst_21 = arith.constant 0.000000e+00 : f32
      %164 = vector.broadcast %cst_21 : f32 to vector<3x128xf32>
      %c0_22 = arith.constant 0 : index
      %c0_23 = arith.constant 0 : index
      %165 = vector.load %arg4[%c0_22, %c0_23] : memref<3x128xf32, #tpu.memory_space<vmem>>, vector<3x128xf32>
      tpu.vector_store %arg4[%c0_22, %c0_23], %164 {strides = array<i32>} : memref<3x128xf32, #tpu.memory_space<vmem>>, vector<3x128xf32>,
    } else {
    }
    %c0 = arith.constant 0 : index
    %c0_1 = arith.constant 0 : index
    %3 = vector.load %arg2[%c0, %c0_1] : memref<27x128xf32, #tpu.memory_space<vmem>>, vector<27x128xf32>
    %4 = vector.extract_strided_slice %3 {offsets = [0, 0], sizes = [9, 128], strides = [1, 1]} : vector<27x128xf32> to vector<9x128xf32>
    %5 = vector.extract_strided_slice %3 {offsets = [9, 0], sizes = [9, 128], strides = [1, 1]} : vector<27x128xf32> to vector<9x128xf32>
    %6 = vector.extract_strided_slice %3 {offsets = [18, 0], sizes = [4, 128], strides = [1, 1]} : vector<27x128xf32> to vector<4x128xf32>
    %7 = vector.extract_strided_slice %3 {offsets = [22, 0], sizes = [4, 128], strides = [1, 1]} : vector<27x128xf32> to vector<4x128xf32>
    %8 = vector.extract_strided_slice %3 {offsets = [26, 0], sizes = [1, 128], strides = [1, 1]} : vector<27x128xf32> to vector<1x128xf32>
    %c1_i32 = arith.constant 1 : i32
    %9 = arith.muli %arg0, %c1_i32 : i32
    %10 = arith.addi %9, %arg1 : i32
    %c128_i32 = arith.constant 128 : i32
    %11 = arith.muli %10, %c128_i32 : i32
    %12 = tpu.iota {dimensions = array<i32: 1>} : vector<1x128xi32>
    %13 = vector.broadcast %11 : i32 to vector<1x128xi32>
    %14 = arith.addi %13, %12 : vector<1x128xi32>
    %c8_i32 = arith.constant 8 : i32
    %15 = vector.broadcast %c8_i32 : i32 to vector<1x128xi32>
    %16 = arith.cmpi slt, %14, %15 : vector<1x128xi32>
    %17 = arith.extui %16 : vector<1x128xi1> to vector<1x128xi32>
    %18 = arith.sitofp %17 : vector<1x128xi32> to vector<1x128xf32>
    %19 = vector.extract_strided_slice %7 {offsets = [0, 0], sizes = [1, 128], strides = [1, 1]} : vector<4x128xf32> to vector<1x128xf32>
    %20 = vector.broadcast %19 : vector<1x128xf32> to vector<9x128xf32>
    %21 = arith.subf %5, %20 : vector<9x128xf32>
    %22 = vector.extract_strided_slice %7 {offsets = [1, 0], sizes = [1, 128], strides = [1, 1]} : vector<4x128xf32> to vector<1x128xf32>
    %23 = vector.broadcast %22 : vector<1x128xf32> to vector<9x128xf32>
    %24 = arith.subf %5, %23 : vector<9x128xf32>
    %25 = vector.extract_strided_slice %7 {offsets = [2, 0], sizes = [1, 128], strides = [1, 1]} : vector<4x128xf32> to vector<1x128xf32>
    %26 = vector.broadcast %25 : vector<1x128xf32> to vector<9x128xf32>
    %27 = arith.subf %5, %26 : vector<9x128xf32>
    %28 = vector.extract_strided_slice %7 {offsets = [3, 0], sizes = [1, 128], strides = [1, 1]} : vector<4x128xf32> to vector<1x128xf32>
    %29 = vector.broadcast %28 : vector<1x128xf32> to vector<9x128xf32>
    %30 = arith.subf %5, %29 : vector<9x128xf32>
    %31 = vector.extract_strided_slice %6 {offsets = [0, 0], sizes = [1, 128], strides = [1, 1]} : vector<4x128xf32> to vector<1x128xf32>
    %32 = vector.broadcast %31 : vector<1x128xf32> to vector<9x128xf32>
    %33 = arith.subf %4, %32 : vector<9x128xf32>
    %34 = vector.extract_strided_slice %6 {offsets = [1, 0], sizes = [1, 128], strides = [1, 1]} : vector<4x128xf32> to vector<1x128xf32>
    %35 = vector.broadcast %34 : vector<1x128xf32> to vector<9x128xf32>
    %36 = arith.subf %4, %35 : vector<9x128xf32>
    %37 = vector.extract_strided_slice %6 {offsets = [2, 0], sizes = [1, 128], strides = [1, 1]} : vector<4x128xf32> to vector<1x128xf32>
    %38 = vector.broadcast %37 : vector<1x128xf32> to vector<9x128xf32>
    %39 = arith.subf %4, %38 : vector<9x128xf32>
    %40 = vector.extract_strided_slice %6 {offsets = [3, 0], sizes = [1, 128], strides = [1, 1]} : vector<4x128xf32> to vector<1x128xf32>
    %41 = vector.broadcast %40 : vector<1x128xf32> to vector<9x128xf32>
    %42 = arith.subf %4, %41 : vector<9x128xf32>
    %cst = arith.constant 0.000000e+00 : f32
    %43 = vector.broadcast %cst : f32 to vector<9x128xf32>
    %44 = arith.cmpf olt, %21, %43 : vector<9x128xf32>
    %cst_2 = arith.constant 0.000000e+00 : f32
    %45 = vector.broadcast %cst_2 : f32 to vector<9x128xf32>
    %46 = arith.cmpf olt, %24, %45 : vector<9x128xf32>
    %cst_3 = arith.constant 0.000000e+00 : f32
    %47 = vector.broadcast %cst_3 : f32 to vector<9x128xf32>
    %48 = arith.cmpf olt, %27, %47 : vector<9x128xf32>
    %cst_4 = arith.constant 0.000000e+00 : f32
    %49 = vector.broadcast %cst_4 : f32 to vector<9x128xf32>
    %50 = arith.cmpf olt, %30, %49 : vector<9x128xf32>
    %false = arith.constant false
    %51 = vector.broadcast %false : i1 to vector<9x128xi1>
    %52 = vector.extract_strided_slice %7 {offsets = [3, 0], sizes = [1, 128], strides = [1, 1]} : vector<4x128xf32> to vector<1x128xf32>
    %53 = vector.extract_strided_slice %7 {offsets = [0, 0], sizes = [1, 128], strides = [1, 1]} : vector<4x128xf32> to vector<1x128xf32>
    %54 = arith.subf %52, %53 : vector<1x128xf32>
    %55 = vector.extract_strided_slice %6 {offsets = [3, 0], sizes = [1, 128], strides = [1, 1]} : vector<4x128xf32> to vector<1x128xf32>
    %56 = vector.extract_strided_slice %6 {offsets = [0, 0], sizes = [1, 128], strides = [1, 1]} : vector<4x128xf32> to vector<1x128xf32>
    %57 = arith.subf %55, %56 : vector<1x128xf32>
    %58 = arith.xori %44, %50 : vector<9x128xi1>
    %59 = vector.broadcast %54 : vector<1x128xf32> to vector<9x128xf32>
    %60 = arith.mulf %33, %59 : vector<9x128xf32>
    %61 = vector.broadcast %57 : vector<1x128xf32> to vector<9x128xf32>
    %62 = arith.mulf %61, %21 : vector<9x128xf32>
    %63 = arith.subf %60, %62 : vector<9x128xf32>
    %64 = vector.broadcast %54 : vector<1x128xf32> to vector<9x128xf32>
    %65 = arith.mulf %63, %64 : vector<9x128xf32>
    %cst_5 = arith.constant 0.000000e+00 : f32
    %66 = vector.broadcast %cst_5 : f32 to vector<9x128xf32>
    %67 = arith.cmpf olt, %65, %66 : vector<9x128xf32>
    %68 = arith.andi %58, %67 : vector<9x128xi1>
    %69 = arith.xori %51, %68 : vector<9x128xi1>
    %70 = vector.extract_strided_slice %7 {offsets = [0, 0], sizes = [1, 128], strides = [1, 1]} : vector<4x128xf32> to vector<1x128xf32>
    %71 = vector.extract_strided_slice %7 {offsets = [1, 0], sizes = [1, 128], strides = [1, 1]} : vector<4x128xf32> to vector<1x128xf32>
    %72 = arith.subf %70, %71 : vector<1x128xf32>
    %73 = vector.extract_strided_slice %6 {offsets = [0, 0], sizes = [1, 128], strides = [1, 1]} : vector<4x128xf32> to vector<1x128xf32>
    %74 = vector.extract_strided_slice %6 {offsets = [1, 0], sizes = [1, 128], strides = [1, 1]} : vector<4x128xf32> to vector<1x128xf32>
    %75 = arith.subf %73, %74 : vector<1x128xf32>
    %76 = arith.xori %46, %44 : vector<9x128xi1>
    %77 = vector.broadcast %72 : vector<1x128xf32> to vector<9x128xf32>
    %78 = arith.mulf %36, %77 : vector<9x128xf32>
    %79 = vector.broadcast %75 : vector<1x128xf32> to vector<9x128xf32>
    %80 = arith.mulf %79, %24 : vector<9x128xf32>
    %81 = arith.subf %78, %80 : vector<9x128xf32>
    %82 = vector.broadcast %72 : vector<1x128xf32> to vector<9x128xf32>
    %83 = arith.mulf %81, %82 : vector<9x128xf32>
    %cst_6 = arith.constant 0.000000e+00 : f32
    %84 = vector.broadcast %cst_6 : f32 to vector<9x128xf32>
    %85 = arith.cmpf olt, %83, %84 : vector<9x128xf32>
    %86 = arith.andi %76, %85 : vector<9x128xi1>
    %87 = arith.xori %69, %86 : vector<9x128xi1>
    %88 = vector.extract_strided_slice %7 {offsets = [1, 0], sizes = [1, 128], strides = [1, 1]} : vector<4x128xf32> to vector<1x128xf32>
    %89 = vector.extract_strided_slice %7 {offsets = [2, 0], sizes = [1, 128], strides = [1, 1]} : vector<4x128xf32> to vector<1x128xf32>
    %90 = arith.subf %88, %89 : vector<1x128xf32>
    %91 = vector.extract_strided_slice %6 {offsets = [1, 0], sizes = [1, 128], strides = [1, 1]} : vector<4x128xf32> to vector<1x128xf32>
    %92 = vector.extract_strided_slice %6 {offsets = [2, 0], sizes = [1, 128], strides = [1, 1]} : vector<4x128xf32> to vector<1x128xf32>
    %93 = arith.subf %91, %92 : vector<1x128xf32>
    %94 = arith.xori %48, %46 : vector<9x128xi1>
    %95 = vector.broadcast %90 : vector<1x128xf32> to vector<9x128xf32>
    %96 = arith.mulf %39, %95 : vector<9x128xf32>
    %97 = vector.broadcast %93 : vector<1x128xf32> to vector<9x128xf32>
    %98 = arith.mulf %97, %27 : vector<9x128xf32>
    %99 = arith.subf %96, %98 : vector<9x128xf32>
    %100 = vector.broadcast %90 : vector<1x128xf32> to vector<9x128xf32>
    %101 = arith.mulf %99, %100 : vector<9x128xf32>
    %cst_7 = arith.constant 0.000000e+00 : f32
    %102 = vector.broadcast %cst_7 : f32 to vector<9x128xf32>
    %103 = arith.cmpf olt, %101, %102 : vector<9x128xf32>
    %104 = arith.andi %94, %103 : vector<9x128xi1>
    %105 = arith.xori %87, %104 : vector<9x128xi1>
    %106 = vector.extract_strided_slice %7 {offsets = [2, 0], sizes = [1, 128], strides = [1, 1]} : vector<4x128xf32> to vector<1x128xf32>
    %107 = vector.extract_strided_slice %7 {offsets = [3, 0], sizes = [1, 128], strides = [1, 1]} : vector<4x128xf32> to vector<1x128xf32>
    %108 = arith.subf %106, %107 : vector<1x128xf32>
    %109 = vector.extract_strided_slice %6 {offsets = [2, 0], sizes = [1, 128], strides = [1, 1]} : vector<4x128xf32> to vector<1x128xf32>
    %110 = vector.extract_strided_slice %6 {offsets = [3, 0], sizes = [1, 128], strides = [1, 1]} : vector<4x128xf32> to vector<1x128xf32>
    %111 = arith.subf %109, %110 : vector<1x128xf32>
    %112 = arith.xori %50, %48 : vector<9x128xi1>
    %113 = vector.broadcast %108 : vector<1x128xf32> to vector<9x128xf32>
    %114 = arith.mulf %42, %113 : vector<9x128xf32>
    %115 = vector.broadcast %111 : vector<1x128xf32> to vector<9x128xf32>
    %116 = arith.mulf %115, %30 : vector<9x128xf32>
    %117 = arith.subf %114, %116 : vector<9x128xf32>
    %118 = vector.broadcast %108 : vector<1x128xf32> to vector<9x128xf32>
    %119 = arith.mulf %117, %118 : vector<9x128xf32>
    %cst_8 = arith.constant 0.000000e+00 : f32
    %120 = vector.broadcast %cst_8 : f32 to vector<9x128xf32>
    %121 = arith.cmpf olt, %119, %120 : vector<9x128xf32>
    %122 = arith.andi %112, %121 : vector<9x128xi1>
    %123 = arith.xori %105, %122 : vector<9x128xi1>
    %124 = vector.extract_strided_slice %6 {offsets = [0, 0], sizes = [1, 128], strides = [1, 1]} : vector<4x128xf32> to vector<1x128xf32>
    %125 = vector.extract_strided_slice %6 {offsets = [2, 0], sizes = [1, 128], strides = [1, 1]} : vector<4x128xf32> to vector<1x128xf32>
    %126 = arith.addf %124, %125 : vector<1x128xf32>
    %cst_9 = arith.constant 5.000000e-01 : f32
    %127 = vector.broadcast %cst_9 : f32 to vector<1x128xf32>
    %128 = arith.mulf %126, %127 : vector<1x128xf32>
    %129 = vector.extract_strided_slice %7 {offsets = [0, 0], sizes = [1, 128], strides = [1, 1]} : vector<4x128xf32> to vector<1x128xf32>
    %130 = vector.extract_strided_slice %7 {offsets = [2, 0], sizes = [1, 128], strides = [1, 1]} : vector<4x128xf32> to vector<1x128xf32>
    %131 = arith.addf %129, %130 : vector<1x128xf32>
    %cst_10 = arith.constant 5.000000e-01 : f32
    %132 = vector.broadcast %cst_10 : f32 to vector<1x128xf32>
    %133 = arith.mulf %131, %132 : vector<1x128xf32>
    %cst_11 = arith.constant dense<true> : vector<9x128xi1>
    %134 = arith.xori %123, %cst_11 : vector<9x128xi1>
    %135 = arith.extui %134 : vector<9x128xi1> to vector<9x128xi32>
    %136 = arith.sitofp %135 : vector<9x128xi32> to vector<9x128xf32>
    %137 = vector.broadcast %18 : vector<1x128xf32> to vector<9x128xf32>
    %138 = arith.mulf %136, %137 : vector<9x128xf32>
    %139 = vector.broadcast %128 : vector<1x128xf32> to vector<9x128xf32>
    %140 = arith.subf %4, %139 : vector<9x128xf32>
    %141 = vector.broadcast %133 : vector<1x128xf32> to vector<9x128xf32>
    %142 = arith.subf %5, %141 : vector<9x128xf32>
    %143 = arith.mulf %140, %140 : vector<9x128xf32>
    %144 = arith.mulf %142, %142 : vector<9x128xf32>
    %145 = arith.addf %143, %144 : vector<9x128xf32>
    %146 = math.sqrt %145 : vector<9x128xf32>
    %147 = arith.mulf %138, %146 : vector<9x128xf32>
    %cst_12 = arith.constant dense<0.000000e+00> : vector<128xf32>
    %148 = vector.multi_reduction <add>, %147, %cst_12 [0] : vector<9x128xf32> to vector<128xf32>
    %149 = vector.shape_cast %148 : vector<128xf32> to vector<1x128xf32>
    %cst_13 = arith.constant dense<0.000000e+00> : vector<128xf32>
    %150 = vector.multi_reduction <add>, %138, %cst_13 [0] : vector<9x128xf32> to vector<128xf32>
    %151 = vector.shape_cast %150 : vector<128xf32> to vector<1x128xf32>
    %cst_14 = arith.constant 0.000000e+00 : f32
    %152 = vector.broadcast %cst_14 : f32 to vector<1x128xf32>
    %153 = arith.cmpf ogt, %8, %152 : vector<1x128xf32>
    %154 = arith.extui %153 : vector<1x128xi1> to vector<1x128xi32>
    %155 = arith.sitofp %154 : vector<1x128xi32> to vector<1x128xf32>
    %156 = arith.mulf %155, %18 : vector<1x128xf32>
    %c0_15 = arith.constant 0 : index
    %c0_16 = arith.constant 0 : index
    %157 = vector.load %arg4[%c0_15, %c0_16] : memref<3x128xf32, #tpu.memory_space<vmem>>, vector<3x128xf32>
    %158 = tpu.concatenate %149, %151, %156 in 0 : vector<1x128xf32>, vector<1x128xf32>, vector<1x128xf32> -> vector<3x128xf32>
    %159 = arith.addf %157, %158 : vector<3x128xf32>
    %c0_17 = arith.constant 0 : index
    %c0_18 = arith.constant 0 : index
    %160 = vector.load %arg4[%c0_17, %c0_18] : memref<3x128xf32, #tpu.memory_space<vmem>>, vector<3x128xf32>
    tpu.vector_store %arg4[%c0_17, %c0_18], %159 {strides = array<i32>} : memref<3x128xf32, #tpu.memory_space<vmem>>, vector<3x128xf32>,
    %c0_i32_19 = arith.constant 0 : i32
    %161 = arith.cmpi eq, %arg1, %c0_i32_19 : i32
    %162 = arith.extui %161 : i1 to i32
    %c0_i32_20 = arith.constant 0 : i32
    %163 = arith.cmpi ne, %162, %c0_i32_20 : i32
    scf.if %163 {
      %c0_21 = arith.constant 0 : index
      %c0_22 = arith.constant 0 : index
      %164 = vector.load %arg4[%c0_21, %c0_22] : memref<3x128xf32, #tpu.memory_space<vmem>>, vector<3x128xf32>
      %165 = vector.extract_strided_slice %164 {offsets = [0, 0], sizes = [1, 128], strides = [1, 1]} : vector<3x128xf32> to vector<1x128xf32>
      %166 = vector.shape_cast %165 : vector<1x128xf32> to vector<1x1x128xf32>
      %cst_23 = arith.constant dense<0.000000e+00> : vector<1xf32>
      %167 = vector.multi_reduction <add>, %166, %cst_23 [1, 2] : vector<1x1x128xf32> to vector<1xf32>
      %168 = vector.shape_cast %167 : vector<1xf32> to vector<1x1x1xf32>
      %169 = vector.extract %168[0, 0, 0] : f32 from vector<1x1x1xf32>
      %170 = vector.extract_strided_slice %164 {offsets = [1, 0], sizes = [1, 128], strides = [1, 1]} : vector<3x128xf32> to vector<1x128xf32>
      %171 = vector.shape_cast %170 : vector<1x128xf32> to vector<1x1x128xf32>
      %cst_24 = arith.constant dense<0.000000e+00> : vector<1xf32>
      %172 = vector.multi_reduction <add>, %171, %cst_24 [1, 2] : vector<1x1x128xf32> to vector<1xf32>
      %173 = vector.shape_cast %172 : vector<1xf32> to vector<1x1x1xf32>
      %174 = vector.extract %173[0, 0, 0] : f32 from vector<1x1x1xf32>
      %175 = vector.extract_strided_slice %164 {offsets = [2, 0], sizes = [1, 128], strides = [1, 1]} : vector<3x128xf32> to vector<1x128xf32>
      %176 = vector.shape_cast %175 : vector<1x128xf32> to vector<1x1x128xf32>
      %cst_25 = arith.constant dense<0.000000e+00> : vector<1xf32>
      %177 = vector.multi_reduction <add>, %176, %cst_25 [1, 2] : vector<1x1x128xf32> to vector<1xf32>
      %178 = vector.shape_cast %177 : vector<1xf32> to vector<1x1x1xf32>
      %179 = vector.extract %178[0, 0, 0] : f32 from vector<1x1x1xf32>
      %180 = tpu.iota {dimensions = array<i32: 0>} : vector<8x128xi32>
      %c0_i32_26 = arith.constant 0 : i32
      %181 = vector.broadcast %c0_i32_26 : i32 to vector<8x128xi32>
      %182 = arith.cmpi eq, %180, %181 : vector<8x128xi32>
      %c1_i32_27 = arith.constant 1 : i32
      %183 = vector.broadcast %c1_i32_27 : i32 to vector<8x128xi32>
      %184 = arith.cmpi eq, %180, %183 : vector<8x128xi32>
      %c2_i32 = arith.constant 2 : i32
      %185 = vector.broadcast %c2_i32 : i32 to vector<8x128xi32>
      %186 = arith.cmpi eq, %180, %185 : vector<8x128xi32>
      %cst_28 = arith.constant 0.000000e+00 : f32
      %187 = vector.broadcast %179 : f32 to vector<8x128xf32>
      %188 = vector.broadcast %cst_28 : f32 to vector<8x128xf32>
      %189 = arith.select %186, %187, %188 : vector<8x128xi1>, vector<8x128xf32>
      %190 = vector.broadcast %174 : f32 to vector<8x128xf32>
      %191 = arith.select %184, %190, %189 : vector<8x128xi1>, vector<8x128xf32>
      %192 = vector.broadcast %169 : f32 to vector<8x128xf32>
      %193 = arith.select %182, %192, %191 : vector<8x128xi1>, vector<8x128xf32>
      %194 = vector.shape_cast %193 : vector<8x128xf32> to vector<1x8x128xf32>
      %c0_29 = arith.constant 0 : index
      %c0_30 = arith.constant 0 : index
      %c0_31 = arith.constant 0 : index
      %195 = vector.load %arg3[%c0_29, %c0_30, %c0_31] : memref<1x8x128xf32, #tpu.memory_space<vmem>>, vector<1x8x128xf32>
      tpu.vector_store %arg3[%c0_29, %c0_30, %c0_31], %194 {strides = array<i32>} : memref<1x8x128xf32, #tpu.memory_space<vmem>>, vector<1x8x128xf32>,
    } else {
    }
    return
  }
  func.func @transform_0(%arg0: i32, %arg1: i32) -> (i32, i32) {
    %c1_i32 = arith.constant 1 : i32
    %0 = arith.muli %arg0, %c1_i32 : i32
    %1 = arith.addi %0, %arg1 : i32
    %c0_i32 = arith.constant 0 : i32
    %c0_i32_0 = arith.constant 0 : i32
    return %c0_i32, %1 : i32, i32
  }
  func.func @transform_1(%arg0: i32, %arg1: i32) -> (i32, i32, i32) {
    %c0_i32 = arith.constant 0 : i32
    %c0_i32_0 = arith.constant 0 : i32
    %c0_i32_1 = arith.constant 0 : i32
    return %arg0, %c0_i32, %c0_i32_0 : i32, i32, i32
  }
}

</mosaic_0001>

<bundles_post_ra>
// kernel: spatial_border_loss_pallas.1
= control target key start
LH: loop header
LB: loop body
LE: loop exit
PB: predicated region body
PF: predicated region fallthrough
CT: control target
= control target key end

     0   :  { %s761_s6 = smov 0   ;;  %s763_s7 = smov 0   ;;  %s1115_s0 = inlined_call_operand.vmem [shape: f32[27,256], index: 0, kind: input, shape index: {}]   ;;  %s1116_s1 = inlined_call_operand.vmem [shape: f32[2,8,128], index: 1, kind: output, shape index: {}]  }
   0x1   :  { %s765_s8 = smov 0   ;;  %s767_s9 = smov 0  }
   0x2   :  { %s769_s10 = smov 0  }
   0x3 LB: > { %s23_s11 = sadd.s32 1, %s742_s9  ;;  %p39_p1 = scmp.ne.s32.totalorder %s734_s7, %s730_s6  ;;  %s746_s10 = sphi %s769_s10, %s11_s10   ;;  %s742_s9 = sphi %s767_s9, %s1171_s9   ;;  %s738_s8 = sphi %s765_s8, %s1170_s8   ;;  %s734_s7 = sphi %s763_s7, %s1169_s7   ;;  %s730_s6 = sphi %s761_s6, %s1168_s6  }
   0x4   : > { %p25_p0 = scmp.ge.s32.totalorder %s23_s11, 2  ;;  %p40_p2 = scmp.eq.s32.totalorder %s746_s10, 0 }
   0x5   : > { %s32_s13 = sadd.s32 1, %s734_s7  ;;  %p642_p5 = scmp.ge.s32.totalorder %s746_s10, 2 }
   0x6   : > { %s1173_s11 = smov (%p25_p0, %s23_s11), 0  ;;  %p41_p3 = por %p40_p2, %p39_p1 }
   0x7   : > { %s29_s12 = ssub.s32 %s742_s9, %s1173_s11  ;;  %91 = sbr.rel (%p642_p5) target bundleno = 21 (0x15), region = 16 }
   0x8   : > { %p30_p4 = scmp.eq.s32.totalorder %s29_s12, 0 }
   0xa   : > { %s796_s14 = scalar_select %p30_p4, %s734_s7, %s32_s13  }
   0xe   : > { %94 = sbr.rel (!%p41_p3) target bundleno = 21 (0x15), region = 20  ;;  %s96_s15 = sand.u32 (%p41_p3), 1, %s734_s7  }
   0xf   : > { %s644_s16 = sshll.u32 (%p41_p3), %s742_s9, 3  ;;  %s643_s17 = sshll.u32 (%p41_p3), %s96_s15, 5 }
  0x10   : > { %s101_s20 = scalar_lea.vmem (%p41_p3), %s1115_s0, %s644_s16  ;;  %s98_s21 = scalar_lea.vmem (%p41_p3), [#allocation3], %s643_s17 }
  0x11   : > { %v135_v0 = vld [vmem:[%s101_s20] sm:$0xff] (%p41_p3)  ;;  %v137_v1 = vld [vmem:[%s101_s20 + $0x10] sm:$0xff] (%p41_p3) }
  0x12   : > { %v139_v2 = vld [vmem:[%s101_s20 + $0x20] sm:$0xff] (%p41_p3)  ;;  %136 = vst [vmem:[%s98_s21] sm:$0xff] (%p41_p3), %v135_v0  ;;  %138 = vst [vmem:[%s98_s21 + $0x8] sm:$0xff] (%p41_p3), %v137_v1  ;;  %v141_v3 = vld [vmem:[%s101_s20 + $0x30] sm:$0xff] (%p41_p3) }
  0x13   : > { %140 = vst [vmem:[%s98_s21 + $0x10] sm:$0xff] (%p41_p3), %v139_v2  ;;  %142 = vst [vmem:[%s98_s21 + $0x18] sm:$0xff] (%p41_p3), %v141_v3 }
  0x15 PF: > { %p645_p6 = scmp.ge.s32.totalorder %s746_s10, 1  ;;  %p147_p7 = scmp.lt.s32.totalorder %s746_s10, 3 }
  0x17   : > { %p148_p8 = pnand %p645_p6, %p147_p7 }
  0x18   : > { %s154_s22 = sand.u32 (!%p148_p8), 1, %s730_s6   ;;  %v188_v4 = vlaneseq (!%p148_p8)  ;;  %v748_v5 = vmov (!%p148_p8), 0.0   ;;  %vm1118_vm0 = vcmask (!%p148_p8), 1046528   ;;  %vm1120_vm9 = vcmask (!%p148_p8), 1040384   ;;  %s648_s25 = sshll.u32 (!%p148_p8), %s738_s8, 7 }
  0x19   : > { %151 = sbr.rel (%p148_p8) target bundleno = 338 (0x152), region = 58  ;;  %s646_s23 = sshll.u32 (!%p148_p8), %s154_s22, 5  ;;  %181 = vst [vmem:[#allocation2] sm:$0x7] (!%p148_p8), %v748_v5 }
  0x1a   : > { %v809_v6 = vshrl.u32 (!%p148_p8), %v188_v4, 7  ;;  %s156_s24 = scalar_lea.vmem (!%p148_p8), [#allocation3], %s646_s23  ;;  %p173_p9 = scmp.lt.s32.totalorder (!%p148_p8), %s738_s8, 1 }
  0x1b   : > { %v816_v10 = vld [vmem:[%s156_s24 + $0x10] sm:$0xff] (!%p148_p8)  ;;  %v820_v13 = vld [vmem:[%s156_s24 + $0x18] sm:$0x7] (!%p148_p8)  ;;  %v833_v21 = vld [vmem:[%s156_s24 + $0x8] sm:$0xff] (!%p148_p8) }
  0x1c   : > { %v812_v7 = vsub.s32 (!%p148_p8), 6, %v809_v6  ;;  %v203_v8 = vsub.s32 (!%p148_p8), 7, %v809_v6  ;;  %v209_v9 = vsub.s32 (!%p148_p8), 0, %v809_v6  ;;  %v215_v11 = vsub.s32 (!%p148_p8), 1, %v809_v6  ;;  %v845_v26 = vld [vmem:[%s156_s24] sm:$0xff] (!%p148_p8) }
  0x1d   : > { %v227_v12 = vsub.s32 (!%p148_p8), 3, %v809_v6  ;;  %v826_v16 = vsub.s32 (!%p148_p8), 2, %v809_v6  ;;  %v233_v18 = vsub.s32 (!%p148_p8), 4, %v809_v6  ;;  %v239_v30 = vsub.s32 (!%p148_p8), 5, %v809_v6 }
  0x1e   : > { %v198_v14 = vrot.slane (!%p148_p8), %v816_v10, %v812_v7  ;;  %v204_v15 = vrot.slane (!%p148_p8), %v816_v10, %v203_v8  ;;  %v210_v17 = vrot.slane (!%p148_p8), %v820_v13, %v209_v9  ;;  %v216_v19 = vrot.slane (!%p148_p8), %v820_v13, %v215_v11 }
  0x1f   : > { %v222_v20 = vrot.slane (!%p148_p8), %v816_v10, %v826_v16  ;;  %v228_v22 = vrot.slane (!%p148_p8), %v816_v10, %v227_v12  ;;  %v234_v29 = vrot.slane (!%p148_p8), %v816_v10, %v233_v18  ;;  %v240_v38 = vrot.slane (!%p148_p8), %v816_v10, %v239_v30 }
  0x20   : > { %v837_v23 = vsub.f32 %v833_v21, %v198_v14  ;;  %v840_v24 = vsub.f32 %v816_v10, %v198_v14  ;;  %v843_v25 = vsub.f32 %v833_v21, %v204_v15  ;;  %v848_v27 = vsub.f32 %v816_v10, %v204_v15  ;;  %s1175_s8 = smov (!%p173_p9, %s738_s8), 1 }
  0x21   : > { %v851_v28 = vsub.f32 %v833_v21, %v210_v17  ;;  %v856_v31 = vsub.f32 %v816_v10, %v210_v17  ;;  %v859_v32 = vsub.f32 %v833_v21, %v216_v19  ;;  %v862_v33 = vsub.f32 %v816_v10, %v216_v19  ;;  %s647_s28 = sshll.u32 %s1175_s8, 3 }
  0x22   : > { %v223_v34 = vsub.f32 %v845_v26, %v222_v20  ;;  %v224_v35 = vsub.f32 %v833_v21, %v222_v20  ;;  %v229_v36 = vsub.f32 %v845_v26, %v228_v22  ;;  %v230_v37 = vsub.f32 %v833_v21, %v228_v22  ;;  %s176_s3 = scalar_lea.vmem %s1116_s1, %s647_s28 }
  0x23   : > { %v235_v39 = vsub.f32 %v845_v26, %v234_v29  ;;  %v252_v40 = vrot.slane %v816_v10, 5  ;;  %v294_v41 = vrot.slane %v816_v10, 1  ;;  %v336_v42 = vrot.slane %v820_v13, 1 }
  0x24   : > { %v236_v43 = vsub.f32 %v833_v21, %v234_v29  ;;  %v241_v44 = vsub.f32 %v845_v26, %v240_v38  ;;  %v416_v45 = vrot.slane %v816_v10, 2  ;;  %v420_v46 = vrot.slane %v820_v13, 2 }
  0x25   : > { %v254_v47 = vsub.f32 %v820_v13, %v252_v40  ;;  %v255_v48 = vsub.f32 %v816_v10, %v252_v40  ;;  %v296_v49 = vsub.f32 %v816_v10, %v294_v41  ;;  %v338_v50 = vsub.f32 %v816_v10, %v336_v42 }
  0x26   : > { %v242_v51 = vsub.f32 %v833_v21, %v240_v38  ;;  %vm243_vm1 = vcmp.lt.f32.partialorder %v837_v23, 0.0  ;;  %vm245_vm2 = vcmp.lt.f32.partialorder %v843_v25, 0.0  ;;  %v377_v52 = vsub.f32 %v820_v13, %v336_v42 }
  0x27   : > { %v418_v53 = vadd.f32 %v416_v45, %v816_v10  ;;  %v887_v54 = vadd.f32 %v420_v46, %v816_v10  ;;  %vm249_vm3 = vcmp.lt.f32.partialorder %v859_v32, 0.0  ;;  %v261_v55 = vrot.slane %v254_v47, %v215_v11  ;;  %vm921_vm11 = vmxor %vm245_vm2, %vm243_vm1 }
  0x28   : > { %v267_v56 = vrot.slane %v255_v48, %v239_v30  ;;  %v302_v57 = vrot.slane %v296_v49, %v812_v7  ;;  %v308_v58 = vrot.slane %v296_v49, %v826_v16  ;;  %vm244_vm4 = vcmp.lt.f32.partialorder %v840_v24, 0.0  ;;  %vm930_vm12 = vmxor %vm243_vm1, %vm249_vm3 }
  0x29   : > { %vm1117_vm5 = vcmp.lt.f32.partialorder %v862_v33, 0.0  ;;  %v894_v59 = vrot.slane %v338_v50, %v203_v8  ;;  %v350_v60 = vrot.slane %v296_v49, %v227_v12  ;;  %v896_v61 = vrot.slane %v377_v52, %v209_v9 }
  0x2a   : > { %v389_v62 = vrot.slane %v296_v49, %v233_v18  ;;  %vm246_vm6 = vcmp.lt.f32.partialorder %v848_v27, 0.0  ;;  %v262_v63 = vmul.f32 %v261_v55, %v223_v34  ;;  %v263_v0 = vmul.f32 %v261_v55, %v224_v35  ;;  %vm939_vm15 = vmxor %vm244_vm4, %vm1117_vm5 }
  0x2b   : > { %v268_v1 = vmul.f32 %v267_v56, %v837_v23  ;;  %v269_v2 = vmul.f32 %v267_v56, %v840_v24  ;;  %vm247_vm7 = vcmp.lt.f32.partialorder %v851_v28, 0.0  ;;  %v303_v3 = vmul.f32 %v302_v57, %v229_v36 }
  0x2c   : > { %v304_v11 = vmul.f32 %v302_v57, %v230_v37  ;;  %v309_v14 = vmul.f32 %v308_v58, %v843_v25  ;;  %v310_v8 = vmul.f32 %v308_v58, %v848_v27  ;;  %vm1119_vm8 = vcmp.lt.f32.partialorder %v856_v31, 0.0 }
  0x2d   : > { %v273_v9 = vrot.slane %v268_v1, 1  ;;  %v274_v12 = vrot.slane %v269_v2, 1  ;;  %v345_v15 = vmul.f32 %v894_v59, %v235_v39  ;;  %v346_v17 = vmul.f32 %v894_v59, %v236_v43 }
  0x2e   : > { %v313_v18 = vrot.slane %v309_v14, 1  ;;  %v314_v19 = vrot.slane %v310_v8, 1  ;;  %v351_v20 = vmul.f32 %v350_v60, %v851_v28  ;;  %v352_v22 = vmul.f32 %v350_v60, %v856_v31 }
  0x2f   : > { %v275_v29 = vsel %vm1118_vm0, %v273_v9, %v274_v12  ;;  %v279_v30 = vsub.f32 %v263_v0, %v274_v12  ;;  %v911_v34 = vmul.f32 %v896_v61, %v241_v44  ;;  %v385_v35 = vmul.f32 %v896_v61, %v242_v51 }
  0x30   : > { %v278_v36 = vsub.f32 %v262_v63, %v275_v29  ;;  %v315_v37 = vsel %vm1118_vm0, %v313_v18, %v314_v19  ;;  %v319_v38 = vsub.f32 %v304_v11, %v314_v19  ;;  %v355_v39 = vrot.slane %v351_v20, 1 }
  0x31   : > { %v281_v40 = vmul.f32 %v279_v30, %v261_v55  ;;  %v318_v41 = vsub.f32 %v303_v3, %v315_v37  ;;  %v356_v42 = vrot.slane %v352_v22, 1  ;;  %v390_v43 = vmul.f32 %v389_v62, %v859_v32 }
  0x32   : > { %v280_v45 = vmul.f32 %v278_v36, %v261_v55  ;;  %v321_v46 = vmul.f32 %v319_v38, %v302_v57  ;;  %v391_v47 = vmul.f32 %v389_v62, %v862_v33  ;;  %v419_v48 = vmul.f32 0.5, %v418_v53 }
  0x33   : > { %vm283_vm10 = vcmp.lt.f32.partialorder %v281_v40, 0.0  ;;  %v320_v49 = vmul.f32 %v318_v41, %v302_v57  ;;  %v357_v50 = vsel %vm1118_vm0, %v355_v39, %v356_v42  ;;  %v361_v51 = vsub.f32 %v346_v17, %v356_v42 }
  0x34   : > { %vm282_vm13 = vcmp.lt.f32.partialorder %v280_v45, 0.0  ;;  %v749_v53 = vmov 0   ;;  %vm323_vm14 = vcmp.lt.f32.partialorder %v321_v46, 0.0  ;;  %v360_v56 = vsub.f32 %v345_v15, %v357_v50 }
  0x35   : > { %v285_v55 = vsel %vm283_vm10, 1, %v749_v53  ;;  %v284_v23 = vsel %vm282_vm13, 1, %v749_v53  ;;  %vm322_vm1 = vcmp.lt.f32.partialorder %v320_v49, 0.0  ;;  %v325_v60 = vsel %vm323_vm14, 1, %v749_v53  ;;  %vm949_vm10 = vmxor %vm246_vm6, %vm244_vm4 }
  0x36   : > { %v288_v58 = vrot.slane %v285_v55, 7  ;;  %v287_v62 = vrot.slane %v284_v23, 7  ;;  %v324_v0 = vsel %vm322_vm1, 1, %v749_v53  ;;  %v327_v1 = vrot.slane %v325_v60, 7  ;;  %vm959_vm13 = vmxor %vm247_vm7, %vm245_vm2 }
  0x37   : > { %v362_v2 = vmul.f32 %v360_v56, %v894_v59  ;;  %v326_v3 = vrot.slane %v324_v0, 7  ;;  %v363_v24 = vmul.f32 %v361_v51, %v894_v59  ;;  %v394_v14 = vrot.slane %v390_v43, 1  ;;  %vm973_vm14 = vmxor %vm1119_vm8, %vm246_vm6 }
  0x38   : > { %v395_v8 = vrot.slane %v391_v47, 1  ;;  %v289_v9 = vsel %vm1120_vm9, %v287_v62, %v288_v58  ;;  %vm965_vm4 = vcmp.ne.s32.totalorder %v287_v62, 0  ;;  %v1133_v25 = vmov 0  ;;  %vm992_vm8 = vmxor %vm249_vm3, %vm247_vm7 }
  0x39   : > { %v1134_v25 = vsel %vm973_vm14, 4294967295, %v1133_v25  ;;  %vm364_vm2 = vcmp.lt.f32.partialorder %v362_v2, 0.0  ;;  %v423_v15 = vmul.f32 0.5, %v887_v54  ;;  %vm291_vm1 = vcmp.ne.s32.totalorder %v289_v9, 0 }
  0x3a   : > { %v328_v59 = vsel %vm1120_vm9, %v326_v3, %v327_v1  ;;  %vm984_vm0 = vcmp.ne.s32.totalorder %v326_v3, 0  ;;  %vm365_vm6 = vcmp.lt.f32.partialorder %v363_v24, 0.0  ;;  %vm998_vm14 = vmand %vm939_vm15, %vm291_vm1  ;;  %v366_v18 = vsel %vm364_vm2, 1, %v749_v53 }
  0x3b   : > { %vm330_vm9 = vcmp.ne.s32.totalorder %v328_v59, 0  ;;  %v367_v19 = vsel %vm365_vm6, 1, %v749_v53  ;;  %vm1141_vm5 = vcmask 1046528   ;;  %vm331_vm3 = vmand %vm921_vm11, %vm984_vm0  ;;  %v368_v28 = vrot.slane %v366_v18, 7 }
  0x3c   : > { %v396_v20 = vsel %vm1141_vm5, %v394_v14, %v395_v8  ;;  %v369_v32 = vrot.slane %v367_v19, 7  ;;  %v400_v29 = vsub.f32 %v385_v35, %v395_v8  ;;  %v189_v30 = vand.u32 127, %v188_v4  ;;  %vm1013_vm7 = vmand %vm949_vm10, %vm330_vm9 }
  0x3d   : > { %v399_v22 = vsub.f32 %v911_v34, %v396_v20  ;;  %v190_v36 = vstv %s648_s25  ;;  %v435_v38 = vrot.slane %v419_v48, %v826_v16  ;;  %v441_v39 = vrot.slane %v423_v15, %v812_v7  ;;  %vm1144_vm0 = vmand %vm930_vm12, %vm965_vm4 }
  0x3e   : > { %vm1024_vm5 = vmxor %vm1144_vm0, %vm331_vm3  ;;  %vm1147_vm11 = vcmask 1040384   ;;  %vm1029_vm15 = vcmp.ne.s32.totalorder %v368_v28, 0  ;;  %v402_v16 = vmul.f32 %v400_v29, %v896_v61  ;;  %v191_v43 = vadd.s32 %v190_v36, %v189_v30 }
  0x3f   : > { %v370_v4 = vsel %vm1147_vm11, %v368_v28, %v369_v32  ;;  %v401_v40 = vmul.f32 %v399_v22, %v896_v61  ;;  %vm334_vm9 = vmxor %vm998_vm14, %vm1013_vm7  ;;  %v436_v7 = vsub.f32 %v845_v26, %v435_v38  ;;  %v437_v41 = vsub.f32 %v833_v21, %v435_v38 }
  0x40   : > { %vm372_vm12 = vcmp.ne.s32.totalorder %v370_v4, 0  ;;  %v442_v42 = vsub.f32 %v833_v21, %v441_v39  ;;  %vm373_vm10 = vmand %vm959_vm13, %vm1029_vm15  ;;  %vm404_vm2 = vcmp.lt.f32.partialorder %v402_v16, 0.0  ;;  %v443_v61 = vsub.f32 %v816_v10, %v441_v39 }
  0x41   : > { %vm403_vm4 = vcmp.lt.f32.partialorder %v401_v40, 0.0  ;;  %vm1150_vm1 = vnez %v1134_v25  ;;  %v406_v26 = vsel %vm404_vm2, 1, %v749_v53  ;;  %v445_v46 = vmul.f32 %v437_v41, %v437_v41  ;;  %vm375_vm13 = vmxor %vm1024_vm5, %vm373_vm10 }
  0x42   : > { %vm374_vm6 = vmand %vm1150_vm1, %vm372_vm12  ;;  %v405_v45 = vsel %vm403_vm4, 1, %v749_v53  ;;  %vm1151_vm3 = vcmp.lt.f32.partialorder %v856_v31, 0.0  ;;  %vm1152_vm0 = vcmp.lt.f32.partialorder %v862_v33, 0.0  ;;  %v408_v48 = vrot.slane %v406_v26, 7 }
  0x43   : > { %vm1055_vm11 = vmxor %vm1152_vm0, %vm1151_vm3  ;;  %v407_v47 = vrot.slane %v405_v45, 7  ;;  %v446_v10 = vmul.f32 %v442_v42, %v442_v42  ;;  %v447_v44 = vmul.f32 %v443_v61, %v443_v61  ;;  %v444_v49 = vmul.f32 %v436_v7, %v436_v7 }
  0x44   : > { %vm1066_vm15 = vmxor %vm334_vm9, %vm374_vm6  ;;  %vm1157_vm12 = vcmask 1040384   ;;  %vm192_vm2 = vcmp.lt.s32.totalorder %v191_v43, 8  ;;  %vm1158_vm3 = vcmask 1046528   ;;  %vm750_vm9 = vmmov 1   ;;  %v514_v43 = vld [vmem:[#allocation2] sm:$0x7] }
  0x45   : > { %v409_v33 = vsel %vm1157_vm12, %v407_v47, %v408_v48  ;;  %vm410_vm4 = vcmp.ne.s32.totalorder %v407_v47, 0  ;;  %v450_v50 = vrot.slane %v446_v10, 1  ;;  %v451_v51 = vrot.slane %v447_v44, 1 }
  0x46   : > { %vm411_vm1 = vcmp.ne.s32.totalorder %v409_v33, 0  ;;  %vm412_vm5 = vmand %vm992_vm8, %vm410_vm4  ;;  %v649_v56 = vsel %vm192_vm2, 1.0, %v748_v5 }
  0x47   : > { %vm413_vm10 = vmand %vm1055_vm11, %vm411_vm1  ;;  %v452_v52 = vsel %vm1158_vm3, %v450_v50, %v451_v51  ;;  %v456_v53 = vadd.f32 %v451_v51, %v445_v46 }
  0x48   : > { %vm414_vm14 = vmxor %vm375_vm13, %vm412_vm5  ;;  %v455_v55 = vadd.f32 %v452_v52, %v444_v49 }
  0x49   : > { %vm415_vm7 = vmxor %vm1066_vm15, %vm413_vm10  ;;  %704 = vrsqrt.f32 %v456_v53  ;;  %vm466_vm13 = vcmp.eq.f32.partialorder %v456_v53, inf  ;;  %v469_v3 = vand.u32 2147483648, %v456_v53  ;;  %vm510_vm10 = vcmp.gt.f32.partialorder %v820_v13, 0.0 }
  0x4a   : > { %vm424_vm6 = vmxor %vm414_vm14, %vm750_vm9  ;;  %706 = vrsqrt.f32 %v455_v55  ;;  %vm459_vm15 = vcmp.eq.f32.partialorder %v455_v55, inf  ;;  %v462_v14 = vand.u32 2147483648, %v455_v55  ;;  %vm461_vm4 = vcmp.eq.f32.partialorder %v455_v55, 0.0 }
  0x4b   : > { %vm425_vm0 = vmxor %vm415_vm7, %vm750_vm9  ;;  %v650_v57 = vsel %vm424_vm6, 1.0, %v748_v5  ;;  %v652_v16 = vsel %vm510_vm10, 1.0, %v748_v5 }
  0x4c   : > { %v651_v23 = vsel %vm425_vm0, 1.0, %v748_v5  ;;  %v430_v58 = vmul.f32 %v650_v57, %v649_v56  ;;  %vm1159_vm8 = vmmov %vm1158_vm3  ;;  %v513_v42 = vmul.f32 %v652_v16, %v649_v56  ;;  %vm563_vm0 = vcmp.eq.s32.totalorder %v809_v6, 2 }
  0x4d   : > { %v431_v60 = vmul.f32 %v651_v23, %v649_v56  ;;  %vm1160_vm11 = vmmov %vm1157_vm12  ;;  %vm468_vm12 = vcmp.eq.f32.partialorder %v456_v53, 0.0 }
  0x4e   : > { %v497_v62 = vrot.slane %v430_v58, 1  ;;  %vm1161_vm2 = vmmov %vm1160_vm11 }
  0x4f   : > { %v498_v63 = vrot.slane %v431_v60, 1  ;;  %vm1162_vm1 = vmmov %vm1158_vm3  ;;  %vm516_vm3 = vcmask 1041408  }
  0x50   : > { %vm1163_vm5 = vmmov %vm1161_vm2 }
  0x51   : > { %v499_v0 = vsel %vm1159_vm8, %v497_v62, %v498_v63  ;;  %v502_v1 = vsel %vm1160_vm11, %v498_v63, 0.0  ;;  %vm1164_vm14 = vmmov %vm1161_vm2  ;;  %vm562_vm8 = vcmp.eq.s32.totalorder %v809_v6, 1  ;;  %vm561_vm11 = vcmp.eq.s32.totalorder %v809_v6, 0 }
  0x52   : > { %v503_v11 = vadd.f32 %v502_v1, %v499_v0  ;;  %vm1165_vm7 = vmmov %vm1161_vm2 }
  0x53   : > { %v705_v2 = vpop.eup %704  ;;  %vm1166_vm9 = vmmov %vm1161_vm2 }
  0x54   : > { %v707_v24 = vpop.eup %706  ;;  %v465_v8 = vmul.f32 %v705_v2, %v456_v53  ;;  %v504_v59 = vrot.slane %v503_v11, 4  ;;  %vm1167_vm6 = vmmov %vm1161_vm2 }
  0x55   : > { %v458_v9 = vmul.f32 %v707_v24, %v455_v55 }
  0x56   : > { %v467_v12 = vsel %vm466_vm13, %v456_v53, %v465_v8  ;;  %v505_v20 = vadd.f32 %v504_v59, %v503_v11 }
  0x57   : > { %v460_v25 = vsel %vm459_vm15, %v455_v55, %v458_v9  ;;  %v470_v15 = vsel %vm468_vm12, %v469_v3, %v467_v12 }
  0x58   : > { %v463_v27 = vsel %vm461_vm4, %v462_v14, %v460_v25  ;;  %v474_v54 = vrot.slane %v470_v15, 7  ;;  %v506_v29 = vrot.slane %v505_v20, 2 }
  0x59   : > { %v473_v17 = vrot.slane %v463_v27, 7 }
  0x5a   : > { %v507_v39 = vadd.f32 %v506_v29, %v505_v20 }
  0x5b   : > { %v475_v18 = vsel %vm1161_vm2, %v473_v17, %v474_v54  ;;  %v478_v19 = vmul.f32 %v473_v17, %v430_v58 }
  0x5c   : > { %v479_v28 = vmul.f32 %v475_v18, %v431_v60  ;;  %v508_v35 = vrot.slane %v507_v39, 1 }
  0x5d   : > { %v482_v32 = vrot.slane %v478_v19, 1 }
  0x5e   : > { %v483_v22 = vrot.slane %v479_v28, 1  ;;  %v509_v41 = vadd.f32 %v508_v35, %v507_v39 }
  0x60   : > { %v484_v30 = vsel %vm1162_vm1, %v482_v32, %v483_v22  ;;  %v487_v36 = vsel %vm1163_vm5, %v483_v22, 0.0 }
  0x61   : > { %v488_v37 = vadd.f32 %v487_v36, %v484_v30 }
  0x63   : > { %v489_v38 = vrot.slane %v488_v37, 4 }
  0x65   : > { %v490_v34 = vadd.f32 %v489_v38, %v488_v37 }
  0x67   : > { %v491_v4 = vrot.slane %v490_v34, 2 }
  0x69   : > { %v492_v40 = vadd.f32 %v491_v4, %v490_v34 }
  0x6b   : > { %v493_v7 = vrot.slane %v492_v40, 1 }
  0x6d   : > { %v494_v61 = vadd.f32 %v493_v7, %v492_v40 }
  0x6f   : > { %v515_v45 = vsel %vm1164_vm14, %v494_v61, %v509_v41 }
  0x70   : > { %v517_v26 = vsel %vm516_vm3, %v515_v45, %v513_v42 }
  0x71   : > { %v518_v46 = vadd.f32 %v517_v26, %v514_v43 }
  0x73   : > { %519 = vst [vmem:[#allocation2] sm:$0x7] %v518_v46 }
  0x7a   : > { %v523_v21 = vld [vmem:[#allocation2] sm:$0x7] }
  0x7b   : > { %v524_v47 = vsel %vm1165_vm7, %v523_v21, 0.0  ;;  %v547_v13 = vrot.slane %v523_v21, 2  ;;  %v535_v48 = vrot.slane %v523_v21, 1 }
  0x7c   : > { %525 = vadd.xlane.f32.xlu0 %v524_v47 }
  0x7d   : > { %v549_v10 = vsel %vm1166_vm9, %v547_v13, 0.0  ;;  %v537_v5 = vsel %vm1167_vm6, %v535_v48, 0.0 }
  0x7e   : > { %550 = vadd.xlane.f32.xlu1 %v549_v10 }
  0x80   : > { %538 = vadd.xlane.f32.xlu0 %v537_v5 }
 0x109   : > { %v526_v44 = vpop.xlane.xlu0 %525 }
 0x10a   : > { %v527_v49 = vrot.slane %v526_v44, 4 }
 0x10b   : > { %v551_v31 = vpop.xlane.xlu1 %550 }
 0x10c   : > { %v528_v33 = vadd.f32 %v527_v49, %v526_v44  ;;  %v552_v50 = vrot.slane %v551_v31, 4 }
 0x10d   : > { %v539_v51 = vpop.xlane.xlu0 %538 }
 0x10e   : > { %v529_v52 = vrot.slane %v528_v33, 2  ;;  %v553_v53 = vadd.f32 %v552_v50, %v551_v31  ;;  %v540_v55 = vrot.slane %v539_v51, 4 }
 0x110   : > { %v554_v56 = vrot.slane %v553_v53, 2  ;;  %v541_v57 = vadd.f32 %v540_v55, %v539_v51  ;;  %v530_v23 = vadd.f32 %v529_v52, %v528_v33 }
 0x112   : > { %v555_v58 = vadd.f32 %v554_v56, %v553_v53  ;;  %v542_v60 = vrot.slane %v541_v57, 2  ;;  %v531_v62 = vrot.slane %v530_v23, 1 }
 0x114   : > { %v543_v63 = vadd.f32 %v542_v60, %v541_v57  ;;  %v532_v0 = vadd.f32 %v531_v62, %v530_v23  ;;  %v556_v1 = vrot.slane %v555_v58, 1 }
 0x116   : > { %655 = vpush %v532_v0  ;;  %v544_v2 = vrot.slane %v543_v63, 1  ;;  %v557_v11 = vadd.f32 %v556_v1, %v555_v58 }
 0x118   : > { %v545_v3 = vadd.f32 %v544_v2, %v543_v63 }
 0x11a   : > { %657 = vpush %v545_v3 }
 0x11b   : > { %659 = vpush %v557_v11 }
 0x147   : > { %s656_s26 = spop %655 }
 0x148   : > { %v568_v9 = vstv %s656_s26 }
 0x14b   : > { %s658_s27 = spop %657 }
 0x14c   : > { %v566_v24 = vstv %s658_s27  ;;  %s660_s29 = spop %659 }
 0x14d   : > { %v564_v14 = vstv %s660_s29 }
 0x14e   : > { %v565_v8 = vsel %vm563_vm0, %v564_v14, 0.0 }
 0x14f   : > { %v567_v12 = vsel %vm562_vm8, %v566_v24, %v565_v8 }
 0x150   : > { %v569_v25 = vsel %vm561_vm11, %v568_v9, %v567_v12 }
 0x151   : > { %570 = vst [vmem:[%s176_s3] sm:$0xff] %v569_v25 }
 0x152 PF: > { %s11_s10 = sadd.s32 1, %s746_s10   ;;  %s1168_s6 = smov %s734_s7 }
 0x153   : > { %p8_p10 = scmp.ge.s32.totalorder %s11_s10, 4   ;;  %s1169_s7 = smov %s796_s14 }
 0x154   : > { %s1170_s8 = smov %s742_s9  ;;  %s1171_s9 = smov %s1173_s11 }
 0x155   :  { %10 = sbr.rel (!%p8_p10) target bundleno = 3 (0x3), region = 105 }

</bundles_post_ra>
